<compile_context>
chip_gen: v7x
topology: tpu7x:2x2x1
jax: 0.10.0
libtpu: 0.0.40
codegen_flags: <defaults>
</compile_context>

<pallas_src>
import jax
import jax.numpy as jnp
from jax.experimental import pallas as pl
from jax.experimental.pallas import tpu as pltpu


def actor_kernel(a_ref, v_ref, w1_ref, b1_ref, w2_ref, b2_ref, w3_ref, b3_ref,
                 out_ref, bd_ref):
    # a_ref : (block_b, N, N) f32  un-transposed adjacency blocks
    # v_ref : (f_in, S)       f32  node features, S = block_b*N (lane-dense slab)
    # w*_ref: (out, in) f32 ; b*_ref: (out, 1) f32
    # out   : (f_out, S)      f32
    # bd_ref: (S, S)          f32  scratch: block-diagonal adjacency
    block_b, n = a_ref.shape[0], a_ref.shape[1]

    # Assemble the block-diagonal adjacency once per grid step.  This is a tiny
    # compile-time loop whose body is a single load+store (no growing live
    # ranges), so static unrolling is fine here — the per-graph *compute* loop
    # from the previous version is gone (all layers act on whole slabs).
    # Zeroing every step (not only step 0) keeps megacore-partitioned grids
    # correct: each TensorCore owns its own scratch and may never see step 0.
    if block_b > 1:
        bd_ref[...] = jnp.zeros_like(bd_ref)
    for p in range(block_b):
        bd_ref[p * n:(p + 1) * n, p * n:(p + 1) * n] = a_ref[p]

    # block-diag(A)^T == block-diag(A^T): transpose once, cast to bf16 once,
    # reuse across all three layers.
    bd = jnp.transpose(bd_ref[...]).astype(jnp.bfloat16)            # (S, S)

    w1 = w1_ref[...].astype(jnp.bfloat16)
    w2 = w2_ref[...].astype(jnp.bfloat16)
    w3 = w3_ref[...].astype(jnp.bfloat16)
    b1 = b1_ref[...]
    b2 = b2_ref[...]
    b3 = b3_ref[...]

    v = v_ref[...].astype(jnp.bfloat16)                              # (f_in, S)

    # conv1: h = relu(W1 @ (V^T A^T) + b1)                           -> (10, S)
    t = jnp.dot(v, bd, preferred_element_type=jnp.float32)
    h = jnp.dot(w1, t.astype(jnp.bfloat16),
                preferred_element_type=jnp.float32) + b1
    h = jnp.maximum(h, 0.0)

    # conv2: h = relu(W2 @ (h A^T) + b2)                             -> (10, S)
    t = jnp.dot(h.astype(jnp.bfloat16), bd,
                preferred_element_type=jnp.float32)
    h = jnp.dot(w2, t.astype(jnp.bfloat16),
                preferred_element_type=jnp.float32) + b2
    h = jnp.maximum(h, 0.0)

    # conv3 (reassociated): out = (W3 @ h) A^T + b3                  -> (1, S)
    z = jnp.dot(w3, h.astype(jnp.bfloat16),
                preferred_element_type=jnp.float32)
    o = jnp.dot(z.astype(jnp.bfloat16), bd,
                preferred_element_type=jnp.float32) + b3
    out_ref[...] = o.astype(out_ref.dtype)


def _tpu_vmem_capacity_bytes():
    try:
        return int(pltpu.get_tpu_info().vmem_capacity_bytes)
    except Exception:
        return 64 << 20                     # conservative (v7x-class) fallback


def _choose_block_b(B, N, f_in, f_out, vmem_cap):
    """Graphs per grid step.  Pack 128//N graphs on the lane axis when N < 128
    so slabs are lane-dense, then grow in multiples of that pack within a VMEM
    budget.  On 64-MiB / 2-TensorCore parts (v7x-class) keep an even >= 2 step
    count so both cores get work; on 128-MiB single-core parts (v5e/v6e) prefer
    one big step (the grid is a purely sequential loop there)."""
    if N >= 128 or 128 % N != 0:
        pack = 1      # TODO(synk): N not dividing 128 leaves some lane padding
    else:
        pack = 128 // N
    pack = max(1, min(pack, B))
    while B % pack != 0:
        pack -= 1

    budget = max(vmem_cap // 4, 8 << 20)

    def fits(bb):
        s = bb * N
        need = (2 * bb * N * N * 4          # A block, double-buffered, f32
                + 2 * (f_in + f_out) * s * 4
                + s * s * 4 + s * s * 2     # BD scratch (f32) + bf16 value
                + 64 * s * 4)               # activation temporaries
        return need <= budget

    cands = [bb for bb in range(pack, B + 1, pack) if B % bb == 0 and fits(bb)]
    if not cands:
        cands = [pack]
    if vmem_cap <= (64 << 20):              # v7x-class: 2 TensorCores / chip
        even = [bb for bb in cands if (B // bb) >= 2 and (B // bb) % 2 == 0]
        if even:
            return max(even)
    return max(cands)


def actor_forward(A, V, params, block_b=None):
    """A: (B, N, N) f32, V: (B, N, f_in) f32 -> (B, N, f_out) f32."""
    B, N, _ = A.shape
    f_in = V.shape[-1]
    w1, b1, w2, b2, w3, b3 = params
    f_out = w3.shape[0]

    vmem_cap = _tpu_vmem_capacity_bytes()
    if block_b is None:
        block_b = _choose_block_b(B, N, f_in, f_out, vmem_cap)
    assert B % block_b == 0, (B, block_b)
    S = block_b * N

    # A goes to the kernel untouched (one f32 HBM read; transpose + bf16 cast
    # happen on-chip).  V is tiny (f_in=2), so repacking it into a lane-dense
    # (f_in, B*N) slab is negligible wrapper work.
    # TODO(synk): callers that can supply A pre-cast to bf16 (or int8/fp8 for a
    # quantizable adjacency) would further shrink the dominant HBM stream.
    V_slab = jnp.transpose(V, (2, 0, 1)).reshape(f_in, B * N)

    def full_spec(shape):
        return pl.BlockSpec(shape, lambda i, z=(0,) * len(shape): z)

    # VMEM budget: double-buffered I/O tiles + BD scratch + headroom (the
    # double-buffer factor is no longer counted twice), capped per generation.
    need = (2 * block_b * N * N * 4
            + 2 * (f_in + f_out) * S * 4
            + S * S * 4 + S * S * 2
            + 64 * S * 4)
    vmem_limit = int(min(max(need * 3 // 2 + (4 << 20), 16 << 20),
                         vmem_cap * 3 // 5))

    out_slab = pl.pallas_call(
        actor_kernel,
        out_shape=jax.ShapeDtypeStruct((f_out, B * N), jnp.float32),
        grid_spec=pltpu.PrefetchScalarGridSpec(
            num_scalar_prefetch=0,
            grid=(B // block_b,),
            in_specs=[
                pl.BlockSpec((block_b, N, N), lambda i: (i, 0, 0)),   # A
                pl.BlockSpec((f_in, S), lambda i: (0, i)),            # V slab
                full_spec(w1.shape), full_spec(b1.shape),
                full_spec(w2.shape), full_spec(b2.shape),
                full_spec(w3.shape), full_spec(b3.shape),
            ],
            out_specs=pl.BlockSpec((f_out, S), lambda i: (0, i)),
            scratch_shapes=[pltpu.VMEM((S, S), jnp.float32)],
        ),
        compiler_params=pltpu.CompilerParams(
            dimension_semantics=("parallel",),
            vmem_limit_bytes=vmem_limit),
    )(A, V_slab, w1, b1, w2, b2, w3, b3)

    # (f_out, B*N) -> (B, N, f_out)
    return jnp.transpose(out_slab.reshape(f_out, B, N), (1, 2, 0))


def init_params(key):
    """nn.Linear-style storage: W has shape (out, in), bias (out, 1)."""
    k1, k2, k3 = jax.random.split(key, 3)

    def lin(k, n_in, n_out):
        bound = 1.0 / jnp.sqrt(jnp.float32(n_in))
        kw, kb = jax.random.split(k)
        w = jax.random.uniform(kw, (n_out, n_in), jnp.float32, -bound, bound)
        b = jax.random.uniform(kb, (n_out, 1), jnp.float32, -bound, bound)
        return w, b

    w1, b1 = lin(k1, 2, 10)
    w2, b2 = lin(k2, 10, 10)
    w3, b3 = lin(k3, 10, 1)
    return (w1, b1, w2, b2, w3, b3)


def actor_reference(A, V, params):
    """Pure-JAX f32 reference (NodeToNode = Linear(bmm(A, V)))."""
    w1, b1, w2, b2, w3, b3 = params

    def layer(h, w, b):
        return jnp.einsum('bij,bjf->bif', A, h) @ w.T + b.T

    h = jax.nn.relu(layer(V, w1, b1))
    h = jax.nn.relu(layer(h, w2, b2))
    return layer(h, w3, b3)


if __name__ == "__main__":
    key = jax.random.PRNGKey(0)
    k_a, k_v, k_p = jax.random.split(key, 3)

    B, N = 8, 32
    A = jax.random.uniform(k_a, (B, N, N), jnp.float32)   # adjacency / affinity
    V = jax.random.normal(k_v, (B, N, 2), jnp.float32)    # node coordinates
    params = init_params(k_p)

    out = actor_forward(A, V, params)
    out = jax.block_until_ready(out)
    assert out.shape == (B, N, 1)

    ref = actor_reference(A, V, params)
    # Kernel uses bf16 for A / intermediate activations (f32 accumulation), so
    # compare with a relative-error metric against the pure-f32 reference.
    rel_err = float(jnp.max(jnp.abs(out - ref) / (jnp.abs(ref) + 1.0)))
    assert rel_err < 5e-2, f"mismatch vs reference, rel_err={rel_err}"

    print("KERNEL_OK")
</pallas_src>

<mosaic_0001>
module attributes {stable_mosaic.version = 11 : i64} {
  func.func @actor_kernel(%arg0: i32, %arg1: memref<4x32x32xf32, #tpu.memory_space<vmem>>, %arg2: memref<2x128xf32, #tpu.memory_space<vmem>>, %arg3: memref<10x2xf32, #tpu.memory_space<vmem>>, %arg4: memref<10x1xf32, #tpu.memory_space<vmem>>, %arg5: memref<10x10xf32, #tpu.memory_space<vmem>>, %arg6: memref<10x1xf32, #tpu.memory_space<vmem>>, %arg7: memref<1x10xf32, #tpu.memory_space<vmem>>, %arg8: memref<1x1xf32, #tpu.memory_space<vmem>>, %arg9: memref<1x128xf32, #tpu.memory_space<vmem>>, %arg10: memref<128x128xf32, #tpu.memory_space<vmem>>) attributes {dimension_semantics = [#tpu.dimension_semantics<parallel>], iteration_bounds = array<i64: 2>, scalar_prefetch = 0 : i64, scratch_operands = 1 : i64, tpu.core_type = #tpu.core_type<tc>, window_params = [{transform_indices = @transform_0, window_bounds = array<i64: 4, 32, 32>}, {transform_indices = @transform_1, window_bounds = array<i64: 2, 128>}, {pipeline_mode = #tpu.pipeline_mode<synchronous>, transform_indices = @transform_2, window_bounds = array<i64: 10, 2>}, {pipeline_mode = #tpu.pipeline_mode<synchronous>, transform_indices = @transform_3, window_bounds = array<i64: 10, 1>}, {pipeline_mode = #tpu.pipeline_mode<synchronous>, transform_indices = @transform_4, window_bounds = array<i64: 10, 10>}, {pipeline_mode = #tpu.pipeline_mode<synchronous>, transform_indices = @transform_5, window_bounds = array<i64: 10, 1>}, {pipeline_mode = #tpu.pipeline_mode<synchronous>, transform_indices = @transform_6, window_bounds = array<i64: 1, 10>}, {pipeline_mode = #tpu.pipeline_mode<synchronous>, transform_indices = @transform_7, window_bounds = array<i64: 1, 1>}, {transform_indices = @transform_8, window_bounds = array<i64: 1, 128>}]} {
    %cst = arith.constant 0.000000e+00 : f32
    %0 = vector.broadcast %cst : f32 to vector<128x128xf32>
    %c0 = arith.constant 0 : index
    %c0_0 = arith.constant 0 : index
    %1 = vector.load %arg10[%c0, %c0_0] : memref<128x128xf32, #tpu.memory_space<vmem>>, vector<128x128xf32>
    tpu.vector_store %arg10[%c0, %c0_0], %0 {strides = array<i32>} : memref<128x128xf32, #tpu.memory_space<vmem>>, vector<128x128xf32>,
    %c0_1 = arith.constant 0 : index
    %c0_2 = arith.constant 0 : index
    %c0_3 = arith.constant 0 : index
    %2 = vector.load %arg1[%c0_1, %c0_2, %c0_3] : memref<4x32x32xf32, #tpu.memory_space<vmem>>, vector<1x32x32xf32>
    %3 = vector.shape_cast %2 : vector<1x32x32xf32> to vector<32x32xf32>
    %c0_4 = arith.constant 0 : index
    %c0_5 = arith.constant 0 : index
    %4 = vector.load %arg10[%c0_4, %c0_5] : memref<128x128xf32, #tpu.memory_space<vmem>>, vector<32x32xf32>
    tpu.vector_store %arg10[%c0_4, %c0_5], %3 {strides = array<i32>} : memref<128x128xf32, #tpu.memory_space<vmem>>, vector<32x32xf32>,
    %c1 = arith.constant 1 : index
    %c0_6 = arith.constant 0 : index
    %c0_7 = arith.constant 0 : index
    %5 = vector.load %arg1[%c1, %c0_6, %c0_7] : memref<4x32x32xf32, #tpu.memory_space<vmem>>, vector<1x32x32xf32>
    %6 = vector.shape_cast %5 : vector<1x32x32xf32> to vector<32x32xf32>
    %c32 = arith.constant 32 : index
    %c32_8 = arith.constant 32 : index
    %7 = vector.load %arg10[%c32, %c32_8] : memref<128x128xf32, #tpu.memory_space<vmem>>, vector<32x32xf32>
    tpu.vector_store %arg10[%c32, %c32_8], %6 {strides = array<i32>} : memref<128x128xf32, #tpu.memory_space<vmem>>, vector<32x32xf32>,
    %c2 = arith.constant 2 : index
    %c0_9 = arith.constant 0 : index
    %c0_10 = arith.constant 0 : index
    %8 = vector.load %arg1[%c2, %c0_9, %c0_10] : memref<4x32x32xf32, #tpu.memory_space<vmem>>, vector<1x32x32xf32>
    %9 = vector.shape_cast %8 : vector<1x32x32xf32> to vector<32x32xf32>
    %c64 = arith.constant 64 : index
    %c64_11 = arith.constant 64 : index
    %10 = vector.load %arg10[%c64, %c64_11] : memref<128x128xf32, #tpu.memory_space<vmem>>, vector<32x32xf32>
    tpu.vector_store %arg10[%c64, %c64_11], %9 {strides = array<i32>} : memref<128x128xf32, #tpu.memory_space<vmem>>, vector<32x32xf32>,
    %c3 = arith.constant 3 : index
    %c0_12 = arith.constant 0 : index
    %c0_13 = arith.constant 0 : index
    %11 = vector.load %arg1[%c3, %c0_12, %c0_13] : memref<4x32x32xf32, #tpu.memory_space<vmem>>, vector<1x32x32xf32>
    %12 = vector.shape_cast %11 : vector<1x32x32xf32> to vector<32x32xf32>
    %c96 = arith.constant 96 : index
    %c96_14 = arith.constant 96 : index
    %13 = vector.load %arg10[%c96, %c96_14] : memref<128x128xf32, #tpu.memory_space<vmem>>, vector<32x32xf32>
    tpu.vector_store %arg10[%c96, %c96_14], %12 {strides = array<i32>} : memref<128x128xf32, #tpu.memory_space<vmem>>, vector<32x32xf32>,
    %c0_15 = arith.constant 0 : index
    %c0_16 = arith.constant 0 : index
    %14 = vector.load %arg10[%c0_15, %c0_16] : memref<128x128xf32, #tpu.memory_space<vmem>>, vector<128x128xf32>
    %15 = tpu.transpose %14, [1, 0] : vector<128x128xf32> -> vector<128x128xf32>
    %16 = arith.truncf %15 : vector<128x128xf32> to vector<128x128xbf16>
    %c0_17 = arith.constant 0 : index
    %c0_18 = arith.constant 0 : index
    %17 = vector.load %arg3[%c0_17, %c0_18] : memref<10x2xf32, #tpu.memory_space<vmem>>, vector<10x2xf32>
    %18 = arith.truncf %17 : vector<10x2xf32> to vector<10x2xbf16>
    %c0_19 = arith.constant 0 : index
    %c0_20 = arith.constant 0 : index
    %19 = vector.load %arg5[%c0_19, %c0_20] : memref<10x10xf32, #tpu.memory_space<vmem>>, vector<10x10xf32>
    %20 = arith.truncf %19 : vector<10x10xf32> to vector<10x10xbf16>
    %c0_21 = arith.constant 0 : index
    %c0_22 = arith.constant 0 : index
    %21 = vector.load %arg7[%c0_21, %c0_22] : memref<1x10xf32, #tpu.memory_space<vmem>>, vector<1x10xf32>
    %22 = arith.truncf %21 : vector<1x10xf32> to vector<1x10xbf16>
    %c0_23 = arith.constant 0 : index
    %c0_24 = arith.constant 0 : index
    %23 = vector.load %arg4[%c0_23, %c0_24] : memref<10x1xf32, #tpu.memory_space<vmem>>, vector<10x1xf32>
    %c0_25 = arith.constant 0 : index
    %c0_26 = arith.constant 0 : index
    %24 = vector.load %arg6[%c0_25, %c0_26] : memref<10x1xf32, #tpu.memory_space<vmem>>, vector<10x1xf32>
    %c0_27 = arith.constant 0 : index
    %c0_28 = arith.constant 0 : index
    %25 = vector.load %arg8[%c0_27, %c0_28] : memref<1x1xf32, #tpu.memory_space<vmem>>, vector<1x1xf32>
    %c0_29 = arith.constant 0 : index
    %c0_30 = arith.constant 0 : index
    %26 = vector.load %arg2[%c0_29, %c0_30] : memref<2x128xf32, #tpu.memory_space<vmem>>, vector<2x128xf32>
    %27 = arith.truncf %26 : vector<2x128xf32> to vector<2x128xbf16>
    %cst_31 = arith.constant dense<0.000000e+00> : vector<2x128xf32>
    %28 = tpu.matmul %27, %16, %cst_31 {dimension_numbers = #tpu.dot_dimension_numbers<[1], [0], [0], [1], [0, 0, 1, 1], [], []>} : vector<2x128xbf16>, vector<128x128xbf16>, vector<2x128xf32> -> vector<2x128xf32>
    %29 = arith.truncf %28 : vector<2x128xf32> to vector<2x128xbf16>
    %cst_32 = arith.constant dense<0.000000e+00> : vector<10x128xf32>
    %30 = tpu.matmul %18, %29, %cst_32 {dimension_numbers = #tpu.dot_dimension_numbers<[1], [0], [0], [1], [0, 0, 1, 1], [], []>} : vector<10x2xbf16>, vector<2x128xbf16>, vector<10x128xf32> -> vector<10x128xf32>
    %31 = vector.broadcast %23 : vector<10x1xf32> to vector<10x128xf32>
    %32 = arith.addf %30, %31 : vector<10x128xf32>
    %cst_33 = arith.constant 0.000000e+00 : f32
    %33 = vector.broadcast %cst_33 : f32 to vector<10x128xf32>
    %34 = arith.maximumf %32, %33 : vector<10x128xf32>
    %35 = arith.truncf %34 : vector<10x128xf32> to vector<10x128xbf16>
    %cst_34 = arith.constant dense<0.000000e+00> : vector<10x128xf32>
    %36 = tpu.matmul %35, %16, %cst_34 {dimension_numbers = #tpu.dot_dimension_numbers<[1], [0], [0], [1], [0, 0, 1, 1], [], []>} : vector<10x128xbf16>, vector<128x128xbf16>, vector<10x128xf32> -> vector<10x128xf32>
    %37 = arith.truncf %36 : vector<10x128xf32> to vector<10x128xbf16>
    %cst_35 = arith.constant dense<0.000000e+00> : vector<10x128xf32>
    %38 = tpu.matmul %20, %37, %cst_35 {dimension_numbers = #tpu.dot_dimension_numbers<[1], [0], [0], [1], [0, 0, 1, 1], [], []>} : vector<10x10xbf16>, vector<10x128xbf16>, vector<10x128xf32> -> vector<10x128xf32>
    %39 = vector.broadcast %24 : vector<10x1xf32> to vector<10x128xf32>
    %40 = arith.addf %38, %39 : vector<10x128xf32>
    %cst_36 = arith.constant 0.000000e+00 : f32
    %41 = vector.broadcast %cst_36 : f32 to vector<10x128xf32>
    %42 = arith.maximumf %40, %41 : vector<10x128xf32>
    %43 = arith.truncf %42 : vector<10x128xf32> to vector<10x128xbf16>
    %cst_37 = arith.constant dense<0.000000e+00> : vector<1x128xf32>
    %44 = tpu.matmul %22, %43, %cst_37 {dimension_numbers = #tpu.dot_dimension_numbers<[1], [0], [0], [1], [0, 0, 1, 1], [], []>} : vector<1x10xbf16>, vector<10x128xbf16>, vector<1x128xf32> -> vector<1x128xf32>
    %45 = arith.truncf %44 : vector<1x128xf32> to vector<1x128xbf16>
    %cst_38 = arith.constant dense<0.000000e+00> : vector<1x128xf32>
    %46 = tpu.matmul %45, %16, %cst_38 {dimension_numbers = #tpu.dot_dimension_numbers<[1], [0], [0], [1], [0, 0, 1, 1], [], []>} : vector<1x128xbf16>, vector<128x128xbf16>, vector<1x128xf32> -> vector<1x128xf32>
    %47 = vector.broadcast %25 : vector<1x1xf32> to vector<1x128xf32>
    %48 = arith.addf %46, %47 : vector<1x128xf32>
    %c0_39 = arith.constant 0 : index
    %c0_40 = arith.constant 0 : index
    %49 = vector.load %arg9[%c0_39, %c0_40] : memref<1x128xf32, #tpu.memory_space<vmem>>, vector<1x128xf32>
    tpu.vector_store %arg9[%c0_39, %c0_40], %48 {strides = array<i32>} : memref<1x128xf32, #tpu.memory_space<vmem>>, vector<1x128xf32>,
    return
  }
  func.func @transform_0(%arg0: i32) -> (i32, i32, i32) {
    %c0_i32 = arith.constant 0 : i32
    %c0_i32_0 = arith.constant 0 : i32
    %c0_i32_1 = arith.constant 0 : i32
    return %arg0, %c0_i32, %c0_i32_0 : i32, i32, i32
  }
  func.func @transform_1(%arg0: i32) -> (i32, i32) {
    %c0_i32 = arith.constant 0 : i32
    %c0_i32_0 = arith.constant 0 : i32
    return %c0_i32, %arg0 : i32, i32
  }
  func.func @transform_2(%arg0: i32) -> (i32, i32) {
    %c0_i32 = arith.constant 0 : i32
    %c0_i32_0 = arith.constant 0 : i32
    %c0_i32_1 = arith.constant 0 : i32
    return %c0_i32, %c0_i32_0 : i32, i32
  }
  func.func @transform_3(%arg0: i32) -> (i32, i32) {
    %c0_i32 = arith.constant 0 : i32
    %c0_i32_0 = arith.constant 0 : i32
    %c0_i32_1 = arith.constant 0 : i32
    return %c0_i32, %c0_i32_0 : i32, i32
  }
  func.func @transform_4(%arg0: i32) -> (i32, i32) {
    %c0_i32 = arith.constant 0 : i32
    %c0_i32_0 = arith.constant 0 : i32
    %c0_i32_1 = arith.constant 0 : i32
    return %c0_i32, %c0_i32_0 : i32, i32
  }
  func.func @transform_5(%arg0: i32) -> (i32, i32) {
    %c0_i32 = arith.constant 0 : i32
    %c0_i32_0 = arith.constant 0 : i32
    %c0_i32_1 = arith.constant 0 : i32
    return %c0_i32, %c0_i32_0 : i32, i32
  }
  func.func @transform_6(%arg0: i32) -> (i32, i32) {
    %c0_i32 = arith.constant 0 : i32
    %c0_i32_0 = arith.constant 0 : i32
    %c0_i32_1 = arith.constant 0 : i32
    return %c0_i32, %c0_i32_0 : i32, i32
  }
  func.func @transform_7(%arg0: i32) -> (i32, i32) {
    %c0_i32 = arith.constant 0 : i32
    %c0_i32_0 = arith.constant 0 : i32
    %c0_i32_1 = arith.constant 0 : i32
    return %c0_i32, %c0_i32_0 : i32, i32
  }
  func.func @transform_8(%arg0: i32) -> (i32, i32) {
    %c0_i32 = arith.constant 0 : i32
    %c0_i32_0 = arith.constant 0 : i32
    return %c0_i32, %arg0 : i32, i32
  }
}

</mosaic_0001>

<bundles_post_ra>
// kernel: tpu_custom_call.1
= control target key start
LH: loop header
LB: loop body
LE: loop exit
PB: predicated region body
PF: predicated region fallthrough
CT: control target
= control target key end

     0   :  { %s1572_s0 = inlined_call_operand.hbm [shape: f32[8,32,32], index: 0, kind: input, shape index: {}]   ;;  %s1573_s1 = inlined_call_operand.vmem [shape: f32[2,256], index: 1, kind: input, shape index: {}]   ;;  %s1574_s2 = inlined_call_operand.vmem [shape: f32[10,2], index: 2, kind: input, shape index: {}]   ;;  %s1575_s3 = inlined_call_operand.vmem [shape: f32[10,1], index: 3, kind: input, shape index: {}]   ;;  %s1576_s4 = inlined_call_operand.vmem [shape: f32[10,10], index: 4, kind: input, shape index: {}]   ;;  %s1577_s5 = inlined_call_operand.vmem [shape: f32[10,1], index: 5, kind: input, shape index: {}]   ;;  %s1578_s6 = inlined_call_operand.vmem [shape: f32[1,10], index: 6, kind: input, shape index: {}]   ;;  %s1579_s7 = inlined_call_operand.<no memory space> [shape: f32[1,1], index: 7, kind: input, shape index: {}]   ;;  %s1580_s8 = inlined_call_operand.hbm [shape: f32[1,256], index: 8, kind: output, shape index: {}]  }
   0x1   :  { %v13_v0 = vstv %s1579_s7 }
   0x2   :  { %14 = vst [vmem:[#allocation3] sm:$0x1] %v13_v0 }
   0x3   :  { %15 = vsyncpa [#allocation5], 0 }
   0x4   :  { %17 = vsyncpa [#allocation5 + $0x1], 0 }
   0x5   :  { %18 = vsyncpa [#allocation6], 0 }
   0x6   :  { %20 = vsyncpa [#allocation6 + $0x1], 0  ;;  %s1267_s29 = smov 0   ;;  %s1269_s30 = smov 0  }
   0x7   :  { %s1271_s9 = smov 0   ;;  %s1273_s10 = smov 0  }
   0x8 LB: > { %s1288_s7 = sadd.s32 4294967295, %s1207_s10   ;;  %s914_s11 = sadd.s32 4294967294, %s1207_s10   ;;  %s1207_s10 = sphi %s1273_s10, %s1593_s10   ;;  %s1203_s9 = sphi %s1271_s9, %s1592_s9   ;;  %s1199_s30 = sphi %s1269_s30, %s1591_s30   ;;  %s1195_s29 = sphi %s1267_s29, %s1590_s29  }
   0x9   : > { %s1292_s12 = sadd.s32 1, %s1207_s10   ;;  %s33_s13 = sadd.s32 1, %s1203_s9 }
   0xa   : > { %s30_s14 = ssub.s32 %s1207_s10, %s1292_s12  ;;  %p40_p0 = scmp.ne.s32.totalorder %s1203_s9, %s1199_s30 }
   0xb   : > { %p31_p1 = scmp.eq.s32.totalorder %s30_s14, 0  ;;  %p41_p2 = scmp.eq.s32.totalorder %s1207_s10, 0 }
   0xc   : > { %p46_p3 = scmp.ne.s32.totalorder %s1199_s30, %s1195_s29  ;;  %p47_p4 = scmp.eq.s32.totalorder %s1288_s7, 0 }
   0xd   : > { %s1304_s15 = scalar_select %p31_p1, %s1203_s9, %s33_s13  }
   0xe   : > { %p1306_p5 = por %p41_p2, %p40_p0  ;;  %p1310_p6 = por %p47_p4, %p46_p3 }
   0xf   : > { %p222_p7 = scmp.eq.s32.totalorder %s1288_s7, 1  ;;  %p228_p8 = scmp.eq.s32.totalorder %s914_s11, 1 }
  0x10   : > { %p1067_p10 = scmp.lt.s32.totalorder %s1207_s10, 2  ;;  %s266_s20 = sand.u32 1, %s1203_s9  }
  0x11   : > { %p1317_p11 = por %p222_p7, %p40_p0  ;;  %p1321_p12 = por %p228_p8, %p46_p3 }
  0x12   : > { %s943_s21 = sshll.u32 %s1207_s10, 11  ;;  %s917_s22 = sshll.u32 %s266_s20, 7 }
  0x13   : > { %s1584_s18 = scalar_select %p1317_p11, 1, 0 }
  0x14   : > { %s1585_s19 = scalar_select %p1321_p12, 1, 0 }
  0x15   : > { %s1330_s25 = scalar_lea.hbm %s1572_s0, %s943_s21  ;;  %s270_s26 = scalar_lea.vmem [#allocation4], %s917_s22 }
  0x16   : > { %s278_s27 = sshll.u32 %s270_s26, 4  ;;  %p1334_p13 = pnand %p1067_p10, %p1306_p5  ;;  %s1338_s27 = int_to_ptr.vmem [resolvable:$true] %s278_s27 }
  0x17   : > { %s1340_s11 = scalar_lea.sflag [#allocation5], %s266_s20  ;;  %s1111_s13 = scalar_lea.hbm %s1330_s25, 2048 }
  0x18   : > { %p1112_p0 = scmp.ne.s32.totalorder %s1330_s25, %s1111_s13  ;;  %p1113_p1 = pneg %p1334_p13 }
  0x19   : > { %s1116_s21 = scalar_lea.hbm %s1572_s0, 4096  ;;  %p1117_p4 = scmp.lt.u32.totalorder %s1330_s25, %s1572_s0 }
  0x1a   : > { %p1114_p2 = pnand %p1113_p1, %p1112_p0  ;;  %p1118_p5 = scmp.lt.u32.totalorder %s1116_s21, %s1111_s13 }
  0x1b   : > { %p1120_p8 = scmp.lt.u32.totalorder %s1111_s13, %s1330_s25 }
  0x1c   : > { %p1115_p3 = pneg %p1114_p2  ;;  %p1119_p7 = por %p1118_p5, %p1117_p4 }
  0x1e   : > { %p1121_p10 = por %p1120_p8, %p1119_p7 }
  0x20   : > { %p1122_p9 = pnand %p1121_p10, %p1115_p3 }
  0x22   : > { %1125 = shalt.err (!%p1122_p9)
}
  0x23   : > { %s1126_s20 = scalar_lea.vmem %s1338_s27, 2048  ;;  %s1209_s24 = smov [#allocation4]  }
  0x24   : > { %p1127_p0 = scmp.ne.s32.totalorder %s1338_s27, %s1126_s20  ;;  %s1131_s26 = sshll.u32 %s1209_s24, 4  ;;  %s1132_s26 = int_to_ptr.vmem [resolvable:$false] %s1131_s26 }
  0x25   : > { %s1133_s14 = scalar_lea.vmem %s1132_s26, 4096  ;;  %p1134_p11 = scmp.lt.s32.totalorder %s1338_s27, %s1132_s26 }
  0x26   : > { %p1129_p2 = pnand %p1127_p0, %p1113_p1  ;;  %p1135_p4 = scmp.lt.s32.totalorder %s1133_s14, %s1126_s20 }
  0x28   : > { %p1130_p12 = pneg %p1129_p2  ;;  %p1136_p5 = por %p1135_p4, %p1134_p11 }
  0x2a   : > { %p1137_p7 = pnand %p1136_p5, %p1130_p12 }
  0x2c   : > { %1140 = shalt.err (!%p1137_p7)
}
  0x2d   : > { %s1210_s13 = smov 128   ;;  %s1211_s16 = smov 8  }
  0x2e   : > { %1062 = dma.hbm_to_vmem [thread:$0]  (!%p1334_p13), %s1330_s25, 2048, %s1338_s27, %s1340_s11, %s1210_s13, %s1210_s13, %s1211_s16  }
  0x2f   : > { %p921_p9 = scmp.ge.s32.totalorder %s1207_s10, 1  ;;  %p293_p1 = scmp.lt.s32.totalorder %s1207_s10, 3 }
  0x31   : > { %p294_p3 = pnand %p921_p9, %p293_p1 }
  0x32   : > { %s1371_s21 = sand.u32 (!%p294_p3), 1, %s1199_s30  }
  0x33   : > { %297 = sbr.rel (%p294_p3) target bundleno = 1686 (0x696), region = 52  ;;  %s922_s22 = sshll.u32 (!%p294_p3), %s1371_s21, 7 }
  0x34   : > { %s300_s23 = scalar_lea.sflag (!%p294_p3), [#allocation5], %s1371_s21  ;;  %s1375_s20 = scalar_lea.vmem (!%p294_p3), [#allocation4], %s922_s22 }
  0x3a   : > { %1186 = dma.done.wait (%p1310_p6), %s300_s23, 2048  }
  0x3b   : > { %1188 = vsyncadd (%p1310_p6), %s300_s23, 4294965248  ;;  %v1212_v1 = vmov 0.0   ;;  %v924_v2 = vld [vmem:[%s1375_s20 + $0x20] sm:$0xff]  ;;  %v926_v3 = vld [vmem:[%s1375_s20 + $0x30] sm:$0xff]  ;;  %s1213_s17 = smov 32   ;;  %vm365_vm0 = vcmask 261120  }
  0x3c   : > { %345 = vst [vmem:[#allocation2] sm:$0xff] %v1212_v1  ;;  %346 = vst [vmem:[#allocation2 + $0x8] sm:$0xff] %v1212_v1  ;;  %977 = vmatprep.subr.bf16.mxu0 %v1212_v1  ;;  %997 = vmatprep.subr.bf16.mxu1 %v1212_v1  ;;  %v925_v4 = vld [vmem:[%s1375_s20 + $0x28] sm:$0xff]  ;;  %v927_v5 = vld [vmem:[%s1375_s20 + $0x38] sm:$0xff]  ;;  %s1214_s25 = smov 64   ;;  %s1215_s27 = smov 96  }
  0x3d   : > { %347 = vst [vmem:[#allocation2 + $0x10] sm:$0xff] %v1212_v1  ;;  %348 = vst [vmem:[#allocation2 + $0x18] sm:$0xff] %v1212_v1  ;;  %379 = vrot.lane.b32.xlu0 %v924_v2, %s1213_s17  ;;  %383 = vrot.lane.b32.xlu1 %v926_v3, %s1213_s17  ;;  %v361_v6 = vld [vmem:[%s1375_s20] sm:$0xff]  ;;  %v362_v7 = vld [vmem:[%s1375_s20 + $0x8] sm:$0xff]  ;;  %vm391_vm1 = vcmask 523520   ;;  %vm417_vm2 = vcmask 785920  }
  0x3e   : > { %349 = vst [vmem:[#allocation2 + $0x20] sm:$0xff] %v1212_v1  ;;  %350 = vst [vmem:[#allocation2 + $0x28] sm:$0xff] %v1212_v1  ;;  %v363_v8 = vld [vmem:[%s1375_s20 + $0x10] sm:$0xff]  ;;  %v364_v9 = vld [vmem:[%s1375_s20 + $0x18] sm:$0xff]  ;;  %vm443_vm3 = vcmask 1048320   ;;  %vm1216_vm4 = vmmov 0  }
  0x3f   : > { %351 = vst [vmem:[#allocation2 + $0x30] sm:$0xff] %v1212_v1  ;;  %352 = vst [vmem:[#allocation2 + $0x38] sm:$0xff] %v1212_v1  ;;  %v928_v10 = vld [vmem:[%s1375_s20 + $0x40] sm:$0xff]  ;;  %v929_v11 = vld [vmem:[%s1375_s20 + $0x48] sm:$0xff]  ;;  %993 = vmatprep.mubr.msk.bf16.mxu0 %vm1216_vm4, %v1212_v1  ;;  %999 = vmatprep.mubr.msk.bf16.mxu1 %vm1216_vm4, %v1212_v1  ;;  %p340_p6 = scmp.lt.s32.totalorder %s1288_s7, 1  ;;  %vm574_vm5 = vcmask 1040384  }
  0x40   : > { %353 = vst [vmem:[#allocation2 + $0x40] sm:$0xff] %v1212_v1  ;;  %354 = vst [vmem:[#allocation2 + $0x48] sm:$0xff] %v1212_v1  ;;  %v930_v12 = vld [vmem:[%s1375_s20 + $0x50] sm:$0xff]  ;;  %v931_v13 = vld [vmem:[%s1375_s20 + $0x58] sm:$0xff]  ;;  %vm570_vm6 = vcmask 15360   ;;  %vm678_vm7 = vcmask 1044480  }
  0x41   : > { %355 = vst [vmem:[#allocation2 + $0x50] sm:$0xff] %v1212_v1  ;;  %356 = vst [vmem:[#allocation2 + $0x58] sm:$0xff] %v1212_v1  ;;  %381 = vrot.lane.b32.xlu0 %v925_v4, %s1213_s17  ;;  %385 = vrot.lane.b32.xlu1 %v927_v5, %s1213_s17  ;;  %v932_v14 = vld [vmem:[%s1375_s20 + $0x60] sm:$0xff]  ;;  %v933_v15 = vld [vmem:[%s1375_s20 + $0x68] sm:$0xff]  ;;  %s341_s28 = scalar_select %p340_p6, %s1288_s7, 1  ;;  %vm674_vm8 = vcmask 80896  }
  0x42   : > { %357 = vst [vmem:[#allocation2 + $0x60] sm:$0xff] %v1212_v1  ;;  %358 = vst [vmem:[#allocation2 + $0x68] sm:$0xff] %v1212_v1  ;;  %v934_v16 = vld [vmem:[%s1375_s20 + $0x70] sm:$0xff]  ;;  %v935_v17 = vld [vmem:[%s1375_s20 + $0x78] sm:$0xff]  ;;  %s939_s17 = sshll.u32 %s1288_s7, 4  ;;  %s824_s7 = scalar_lea.sflag [#allocation6], %s1371_s21 }
  0x43   : > { %359 = vst [vmem:[#allocation2 + $0x70] sm:$0xff] %v1212_v1  ;;  %360 = vst [vmem:[#allocation2 + $0x78] sm:$0xff] %v1212_v1  ;;  %s923_s11 = sshll.u32 %s341_s28, 1  ;;  %s1528_s24 = scalar_lea.hbm %s1580_s8, %s939_s17 }
  0x44   : > { %366 = vst.msk [vmem:[#allocation2] sm:$0xff] %vm365_vm0, %v361_v6  ;;  %367 = vst.msk [vmem:[#allocation2 + $0x8] sm:$0xff] %vm365_vm0, %v362_v7  ;;  %s343_s14 = scalar_lea.vmem %s1573_s1, %s923_s11  ;;  %p1587_p12 = scmp.ne.s32.totalorder %s1584_s18, 0 }
  0x45   : > { %368 = vst.msk [vmem:[#allocation2 + $0x10] sm:$0xff] %vm365_vm0, %v363_v8  ;;  %369 = vst.msk [vmem:[#allocation2 + $0x18] sm:$0xff] %vm365_vm0, %v364_v9  ;;  %405 = vrot.lane.b32.xlu0 %v928_v10, %s1214_s25  ;;  %407 = vrot.lane.b32.xlu1 %v929_v11, %s1214_s25  ;;  %v517_v5 = vld [vmem:[%s343_s14] sm:$0x3]  ;;  %v1217_v10 = vmov 0   ;;  %s1218_s14 = smov [#allocation7]  }
  0x46   : > { %v518_v8 = vpack.c.bf16 %v517_v5, %v517_v5  ;;  %v512_v9 = vld [vmem:[%s1575_s3] sm:$0xff]  ;;  %1109 = vset.pattern.permute.xlu1 %v1217_v10  ;;  %v513_v11 = vld [vmem:[%s1575_s3 + $0x8] sm:$0x3]  ;;  %s1145_s13 = sshll.u32 %s1218_s14, 4  ;;  %s1146_s13 = int_to_ptr.vmem [resolvable:$false] %s1145_s13 }
  0x47   : > { %s1147_s16 = scalar_lea.vmem %s1146_s13, 32 }
  0x49   : > { %409 = vrot.lane.b32.xlu0 %v930_v12, %s1214_s25  ;;  %411 = vrot.lane.b32.xlu1 %v931_v13, %s1214_s25  ;;  %v514_v12 = vld [vmem:[%s1577_s5] sm:$0xff]  ;;  %v515_v13 = vld [vmem:[%s1577_s5 + $0x8] sm:$0x3]  ;;  %s338_s25 = scalar_lea.vmem [#allocation7], %s1371_s21 }
  0x4b   : > { %v448_v18 = vld [vmem:[#allocation2] sm:$0xff]  ;;  %v449_v19 = vld [vmem:[#allocation2 + $0x8] sm:$0xff] }
  0x4c   : > { %v450_v20 = vld [vmem:[#allocation2 + $0x10] sm:$0xff]  ;;  %v451_v21 = vld [vmem:[#allocation2 + $0x18] sm:$0xff] }
  0x4d   : > { %431 = vrot.lane.b32.xlu0 %v932_v14, %s1215_s27  ;;  %433 = vrot.lane.b32.xlu1 %v933_v15, %s1215_s27  ;;  %v516_v14 = vld [vmem:[#allocation3] sm:$0x1] }
  0x51   : > { %435 = vrot.lane.b32.xlu0 %v934_v16, %s1215_s27  ;;  %437 = vrot.lane.b32.xlu1 %v935_v17, %s1215_s27  ;;  %v504_v16 = vld [vmem:[%s1574_s2] sm:$0xff]  ;;  %v505_v17 = vld [vmem:[%s1574_s2 + $0x8] sm:$0x3]  ;;  %s836_s27 = sshll.u32 %s338_s25, 4  ;;  %s1530_s27 = int_to_ptr.vmem [resolvable:$true] %s836_s27 }
  0x52   : > { %s1141_s26 = scalar_lea.vmem %s1530_s27, 16  ;;  %p1148_p10 = scmp.lt.s32.totalorder %s1530_s27, %s1146_s13 }
  0x53   : > { %p1142_p11 = scmp.ne.s32.totalorder %s1530_s27, %s1141_s26  ;;  %p1149_p0 = scmp.lt.s32.totalorder %s1147_s16, %s1141_s26 }
  0x55   : > { %562 = vperm.xlu1 %1109, %v512_v9   ;;  %p1143_p13 = pnand %p1142_p11, %p1587_p12  ;;  %p1150_p2 = por %p1149_p0, %p1148_p10 }
  0x57   : > { %p1144_p8 = pneg %p1143_p13 }
  0x59   : > { %567 = vperm.xlu1 %1109, %v513_v11   ;;  %p1151_p4 = pnand %p1150_p2, %p1144_p8 }
  0x5d   : > { %666 = vperm.xlu1 %1109, %v514_v12  }
  0x61   : > { %671 = vperm.xlu1 %1109, %v515_v13  }
  0x65   : > { %775 = vperm.xlu1 %1109, %v516_v14  }
  0x6f   : > { %464 = vxpose.xlu0.b32.start [1/16] %v448_v18, 128 }
  0x73   : > { %465 = vxpose.xlu0.b32.cont [2/16] %v449_v19, 128 }
  0x77   : > { %466 = vxpose.xlu0.b32.cont [3/16] %v450_v20, 128 }
  0x7b   : > { %467 = vxpose.xlu0.b32.cont [4/16] %v451_v21, 128 }
  0xaf   : > { %v380_v22 = vpop.permute.xlu0 %379  ;;  %v384_v23 = vpop.permute.xlu1 %383 }
  0xb0   : > { %392 = vst.msk [vmem:[#allocation2 + $0x20] sm:$0xff] %vm391_vm1, %v380_v22  ;;  %394 = vst.msk [vmem:[#allocation2 + $0x30] sm:$0xff] %vm391_vm1, %v384_v23  ;;  %v506_v23 = vpack.c.bf16 %v505_v17, %v504_v16 }
  0xb3   : > { %v382_v24 = vpop.permute.xlu0 %381  ;;  %v386_v25 = vpop.permute.xlu1 %385 }
  0xb4   : > { %393 = vst.msk [vmem:[#allocation2 + $0x28] sm:$0xff] %vm391_vm1, %v382_v24  ;;  %395 = vst.msk [vmem:[#allocation2 + $0x38] sm:$0xff] %vm391_vm1, %v386_v25 }
  0xb7   : > { %v452_v26 = vld [vmem:[#allocation2 + $0x20] sm:$0xff]  ;;  %v406_v27 = vpop.permute.xlu0 %405  ;;  %v408_v28 = vpop.permute.xlu1 %407  ;;  %v454_v32 = vld [vmem:[#allocation2 + $0x30] sm:$0xff] }
  0xb8   : > { %468 = vxpose.xlu0.b32.cont [5/16] %v452_v26, 128  ;;  %418 = vst.msk [vmem:[#allocation2 + $0x40] sm:$0xff] %vm417_vm2, %v406_v27  ;;  %419 = vst.msk [vmem:[#allocation2 + $0x48] sm:$0xff] %vm417_vm2, %v408_v28 }
  0xbb   : > { %v453_v29 = vld [vmem:[#allocation2 + $0x28] sm:$0xff]  ;;  %v410_v30 = vpop.permute.xlu0 %409  ;;  %v412_v31 = vpop.permute.xlu1 %411  ;;  %v455_v35 = vld [vmem:[#allocation2 + $0x38] sm:$0xff] }
  0xbc   : > { %469 = vxpose.xlu0.b32.cont [6/16] %v453_v29, 128  ;;  %420 = vst.msk [vmem:[#allocation2 + $0x50] sm:$0xff] %vm417_vm2, %v410_v30  ;;  %421 = vst.msk [vmem:[#allocation2 + $0x58] sm:$0xff] %vm417_vm2, %v412_v31 }
  0xbf   : > { %v432_v33 = vpop.permute.xlu0 %431  ;;  %v434_v34 = vpop.permute.xlu1 %433  ;;  %v456_v38 = vld [vmem:[#allocation2 + $0x40] sm:$0xff]  ;;  %v457_v39 = vld [vmem:[#allocation2 + $0x48] sm:$0xff] }
  0xc0   : > { %470 = vxpose.xlu0.b32.cont [7/16] %v454_v32, 128  ;;  %444 = vst.msk [vmem:[#allocation2 + $0x60] sm:$0xff] %vm443_vm3, %v432_v33  ;;  %445 = vst.msk [vmem:[#allocation2 + $0x68] sm:$0xff] %vm443_vm3, %v434_v34 }
  0xc3   : > { %v436_v36 = vpop.permute.xlu0 %435  ;;  %v438_v37 = vpop.permute.xlu1 %437  ;;  %v458_v40 = vld [vmem:[#allocation2 + $0x50] sm:$0xff]  ;;  %v459_v41 = vld [vmem:[#allocation2 + $0x58] sm:$0xff] }
  0xc4   : > { %471 = vxpose.xlu0.b32.cont [8/16] %v455_v35, 128  ;;  %446 = vst.msk [vmem:[#allocation2 + $0x70] sm:$0xff] %vm443_vm3, %v436_v36  ;;  %447 = vst.msk [vmem:[#allocation2 + $0x78] sm:$0xff] %vm443_vm3, %v438_v37 }
  0xc7   : > { %v460_v42 = vld [vmem:[#allocation2 + $0x60] sm:$0xff]  ;;  %v461_v43 = vld [vmem:[#allocation2 + $0x68] sm:$0xff] }
  0xc8   : > { %472 = vxpose.xlu0.b32.cont [9/16] %v456_v38, 128  ;;  %v507_v38 = vld [vmem:[%s1576_s4] sm:$0xff] }
  0xcb   : > { %v462_v44 = vld [vmem:[#allocation2 + $0x70] sm:$0xff]  ;;  %v463_v45 = vld [vmem:[#allocation2 + $0x78] sm:$0xff] }
  0xcc   : > { %473 = vxpose.xlu0.b32.cont [10/16] %v457_v39, 128  ;;  %v508_v39 = vld [vmem:[%s1576_s4 + $0x8] sm:$0x3] }
  0xd0   : > { %474 = vxpose.xlu0.b32.cont [11/16] %v458_v40, 128 }
  0xd4   : > { %475 = vxpose.xlu0.b32.cont [12/16] %v459_v41, 128  ;;  %v563_v24 = vpop.permute.xlu1 %562 }
  0xd8   : > { %476 = vxpose.xlu0.b32.cont [13/16] %v460_v42, 128  ;;  %v568_v28 = vpop.permute.xlu1 %567 }
  0xdc   : > { %477 = vxpose.xlu0.b32.cont [14/16] %v461_v43, 128  ;;  %v509_v43 = vpack.c.bf16 %v508_v39, %v507_v38 }
  0xe0   : > { %478 = vxpose.xlu0.b32.cont [15/16] %v462_v44, 128  ;;  %v667_v44 = vpop.permute.xlu1 %666 }
  0xe4   : > { %479 = vxpose.xlu0.b32.end [16/16] %v463_v45, 128 }
 0x10d   : > { %1110 = vset.pattern.permute.xlu0 %v1217_v10 }
 0x128   : > { %v480_v46 = vpop.trf.xlu0 }
 0x12c   : > { %v481_v47 = vpop.trf.xlu0 }
 0x12d   : > { %v1419_v48 = vpack.c.bf16 %v481_v47, %v480_v46 }
 0x12f   : > { %978 = vmatpush3.bf16.msra.mxu0 %v1419_v48 }
 0x130   : > { %v482_v49 = vpop.trf.xlu0  ;;  %979 = vmatprep.subr.bf16.mxu0 %v1212_v1 }
 0x134   : > { %v483_v50 = vpop.trf.xlu0 }
 0x135   : > { %v1423_v51 = vpack.c.bf16 %v483_v50, %v482_v49 }
 0x137   : > { %980 = vmatpush3.bf16.msra.mxu0 %v1423_v51 }
 0x138   : > { %v484_v52 = vpop.trf.xlu0  ;;  %981 = vmatprep.subr.bf16.mxu0 %v1212_v1 }
 0x13c   : > { %v485_v53 = vpop.trf.xlu0 }
 0x13d   : > { %v1427_v54 = vpack.c.bf16 %v485_v53, %v484_v52 }
 0x13f   : > { %982 = vmatpush3.bf16.msra.mxu0 %v1427_v54 }
 0x140   : > { %v486_v55 = vpop.trf.xlu0  ;;  %983 = vmatprep.subr.bf16.mxu0 %v1212_v1 }
 0x144   : > { %v487_v56 = vpop.trf.xlu0 }
 0x145   : > { %v1431_v57 = vpack.c.bf16 %v487_v56, %v486_v55 }
 0x147   : > { %984 = vmatpush3.bf16.msra.mxu0 %v1431_v57 }
 0x148   : > { %v488_v58 = vpop.trf.xlu0  ;;  %985 = vmatprep.subr.bf16.mxu0 %v1212_v1 }
 0x14c   : > { %v489_v59 = vpop.trf.xlu0 }
 0x14d   : > { %v1435_v60 = vpack.c.bf16 %v489_v59, %v488_v58 }
 0x14f   : > { %986 = vmatpush3.bf16.msra.mxu0 %v1435_v60 }
 0x150   : > { %v490_v61 = vpop.trf.xlu0  ;;  %987 = vmatprep.subr.bf16.mxu0 %v1212_v1 }
 0x154   : > { %v491_v62 = vpop.trf.xlu0 }
 0x155   : > { %v1439_v63 = vpack.c.bf16 %v491_v62, %v490_v61  ;;  %v778_v62 = vlaneseq }
 0x157   : > { %988 = vmatpush3.bf16.msra.mxu0 %v1439_v63 }
 0x158   : > { %v492_v0 = vpop.trf.xlu0  ;;  %989 = vmatprep.subr.bf16.mxu0 %v1212_v1 }
 0x15c   : > { %v493_v2 = vpop.trf.xlu0 }
 0x15d   : > { %v1445_v3 = vpack.c.bf16 %v493_v2, %v492_v0 }
 0x15f   : > { %990 = vmatpush3.bf16.msra.mxu0 %v1445_v3 }
 0x160   : > { %v494_v4 = vpop.trf.xlu0  ;;  %991 = vmatprep.subr.bf16.mxu0 %v1212_v1 }
 0x164   : > { %v495_v6 = vpop.trf.xlu0 }
 0x165   : > { %v503_v7 = vpack.c.bf16 %v495_v6, %v494_v4 }
 0x167   : > { %992 = vmatpush3.bf16.msra.mxu0 %v503_v7 }
 0x168   : > { %1035 = vmatprep.subr.bf16.mxu0 %v1212_v1 }
 0x16a   : > { %994 = vmatmul.mubr.bf16.vlgmr.msra.gmra.mrb[0].mxu0 %v518_v8 }
 0x16b   : > { %1036 = vmatpush3.bf16.msra.mxu0 %v1419_v48  ;;  %1051 = vmatprep.mubr.msk.bf16.mxu0 %vm1216_vm4, %v1212_v1 }
 0x16c   : > { %1037 = vmatprep.subr.bf16.mxu0 %v1212_v1 }
 0x16f   : > { %1038 = vmatpush3.bf16.msra.mxu0 %v1423_v51 }
 0x170   : > { %1039 = vmatprep.subr.bf16.mxu0 %v1212_v1 }
 0x173   : > { %1040 = vmatpush3.bf16.msra.mxu0 %v1427_v54 }
 0x174   : > { %1041 = vmatprep.subr.bf16.mxu0 %v1212_v1 }
 0x177   : > { %1042 = vmatpush3.bf16.msra.mxu0 %v1431_v57 }
 0x178   : > { %1043 = vmatprep.subr.bf16.mxu0 %v1212_v1 }
 0x17b   : > { %1044 = vmatpush3.bf16.msra.mxu0 %v1435_v60 }
 0x17c   : > { %1045 = vmatprep.subr.bf16.mxu0 %v1212_v1 }
 0x17f   : > { %1046 = vmatpush3.bf16.msra.mxu0 %v1439_v63 }
 0x180   : > { %1047 = vmatprep.subr.bf16.mxu0 %v1212_v1 }
 0x183   : > { %1048 = vmatpush3.bf16.msra.mxu0 %v1445_v3 }
 0x184   : > { %1049 = vmatprep.subr.bf16.mxu0 %v1212_v1 }
 0x187   : > { %1050 = vmatpush3.bf16.msra.mxu0 %v503_v7 }
 0x23d   : > { %v553_v15 = vpop.f32.mrb[0].mxu0 }
 0x23e   : > { %v559_v18 = vpack.c.bf16 %v553_v15, %v553_v15  ;;  %v995_v19 = vpop.f32.mrb[1].mxu0 }
 0x23f   : > { %v556_v20 = vpop.f32.mrb[2].mxu0 }
 0x240   : > { %v996_v21 = vpop.f32.mrb[3].mxu0  ;;  %v576_v22 = vsel %vm574_vm5, %v559_v18, 0 }
 0x241   : > { %998 = vmatpush3.bf16.msra.mxu1 %v576_v22 }
 0x242   : > { %1003 = vmatprep.subr.bf16.mxu1 %v1212_v1 }
 0x244   : > { %1000 = vmatmul.mubr.msk.bf16.vlgmr.msra.gmra.mrb[0].mxu1 %vm570_vm6, %v506_v23 }
 0x245   : > { %1004 = vmatpush3.bf16.msra.mxu1 %v1419_v48  ;;  %1019 = vmatprep.mubr.msk.bf16.mxu1 %vm1216_vm4, %v1212_v1  ;;  %v672_v48 = vpop.permute.xlu1 %671 }
 0x246   : > { %1005 = vmatprep.subr.bf16.mxu1 %v1212_v1 }
 0x249   : > { %1006 = vmatpush3.bf16.msra.mxu1 %v1423_v51  ;;  %v776_v2 = vpop.permute.xlu1 %775 }
 0x24a   : > { %1007 = vmatprep.subr.bf16.mxu1 %v1212_v1 }
 0x24d   : > { %1008 = vmatpush3.bf16.msra.mxu1 %v1427_v54  ;;  %v510_v54 = vld [vmem:[%s1578_s6] sm:$0x1] }
 0x24e   : > { %1009 = vmatprep.subr.bf16.mxu1 %v1212_v1 }
 0x251   : > { %1010 = vmatpush3.bf16.msra.mxu1 %v1431_v57 }
 0x252   : > { %1011 = vmatprep.subr.bf16.mxu1 %v1212_v1 }
 0x255   : > { %1012 = vmatpush3.bf16.msra.mxu1 %v1435_v60 }
 0x256   : > { %1013 = vmatprep.subr.bf16.mxu1 %v1212_v1 }
 0x259   : > { %1014 = vmatpush3.bf16.msra.mxu1 %v1439_v63  ;;  %v779_v63 = vshrl.u32 %v778_v62, 7 }
 0x25a   : > { %1015 = vmatprep.subr.bf16.mxu1 %v1212_v1 }
 0x25b   : > { %v780_v0 = vsub.s32 0, %v779_v63 }
 0x25d   : > { %1016 = vmatpush3.bf16.msra.mxu1 %v1445_v3  ;;  %v781_v3 = vrot.slane %v776_v2, %v780_v0 }
 0x25e   : > { %1017 = vmatprep.subr.bf16.mxu1 %v1212_v1 }
 0x261   : > { %1018 = vmatpush3.bf16.msra.mxu1 %v503_v7 }
 0x262   : > { %1023 = vmatprep.subr.bf16.mxu1 %v1212_v1 }
 0x317   : > { %v612_v25 = vpop.f32.mrb[0].mxu1 }
 0x318   : > { %v613_v26 = vadd.f32 %v612_v25, %v563_v24  ;;  %v1001_v27 = vpop.f32.mrb[1].mxu1 }
 0x319   : > { %v615_v29 = vpop.f32.mrb[2].mxu1 }
 0x31a   : > { %v616_v30 = vadd.f32 %v615_v29, %v568_v28  ;;  %v1002_v31 = vpop.f32.mrb[3].mxu1  ;;  %v619_v32 = vmax.f32 %v613_v26, 0.0 }
 0x31c   : > { %v620_v33 = vmax.f32 %v616_v30, 0.0 }
 0x31e   : > { %v621_v34 = vpack.c.bf16 %v620_v33, %v619_v32 }
 0x320   : > { %1020 = vmatmul.mubr.bf16.vlgmr.msra.gmra.mrb[4].mxu1 %v621_v34 }
 0x321   : > { %1025 = vmatprep.mubr.msk.bf16.mxu1 %vm1216_vm4, %v1212_v1 }
 0x3f3   : > { %v656_v35 = vpop.f32.mrb[4].mxu1 }
 0x3f4   : > { %v1021_v36 = vpop.f32.mrb[5].mxu1 }
 0x3f5   : > { %v659_v37 = vpop.f32.mrb[6].mxu1 }
 0x3f6   : > { %v663_v40 = vpack.c.bf16 %v659_v37, %v656_v35  ;;  %v1022_v41 = vpop.f32.mrb[7].mxu1 }
 0x3f8   : > { %v680_v42 = vsel %vm678_vm7, %v663_v40, 0 }
 0x3f9   : > { %1024 = vmatpush3.bf16.msra.mxu1 %v680_v42 }
 0x3fa   : > { %1029 = vmatprep.subr.bf16.mxu1 %v1212_v1 }
 0x3fc   : > { %1026 = vmatmul.mubr.msk.bf16.vlgmr.msra.gmra.mrb[8].mxu1 %vm674_vm8, %v509_v43 }
 0x3fd   : > { %1031 = vmatprep.mubr.msk.bf16.mxu1 %vm1216_vm4, %v1212_v1  ;;  %v511_v1 = vpack.c.bf16 %v510_v54, %v510_v54 }
 0x4cf   : > { %v716_v45 = vpop.f32.mrb[8].mxu1 }
 0x4d0   : > { %v717_v46 = vadd.f32 %v716_v45, %v667_v44  ;;  %v1027_v47 = vpop.f32.mrb[9].mxu1 }
 0x4d1   : > { %v719_v49 = vpop.f32.mrb[10].mxu1 }
 0x4d2   : > { %v720_v50 = vadd.f32 %v719_v49, %v672_v48  ;;  %v1028_v51 = vpop.f32.mrb[11].mxu1  ;;  %v723_v52 = vmax.f32 %v717_v46, 0.0 }
 0x4d4   : > { %v724_v53 = vmax.f32 %v720_v50, 0.0 }
 0x4d6   : > { %v725_v55 = vpack.c.bf16 %v724_v53, %v723_v52 }
 0x4d8   : > { %v730_v56 = vsel %vm678_vm7, %v725_v55, 0 }
 0x4d9   : > { %1030 = vmatpush3.bf16.msra.mxu1 %v730_v56 }
 0x4dc   : > { %1032 = vmatmul.mubr.msk.bf16.vlgmr.msra.gmra.mrb[12].mxu1 %vm674_vm8, %v511_v1 }
 0x5af   : > { %v766_v57 = vpop.f32.mrb[12].mxu1 }
 0x5b0   : > { %v772_v58 = vpack.c.bf16 %v766_v57, %v766_v57  ;;  %v1033_v59 = vpop.f32.mrb[13].mxu1 }
 0x5b1   : > { %v769_v60 = vpop.f32.mrb[14].mxu1 }
 0x5b2   : > { %1052 = vmatmul.mubr.bf16.vlgmr.msra.gmra.mrb[4].mxu0 %v772_v58  ;;  %v1034_v61 = vpop.f32.mrb[15].mxu1 }
 0x685   : > { %v816_v4 = vpop.f32.mrb[4].mxu0 }
 0x686   : > { %v817_v5 = vadd.f32 %v816_v4, %v781_v3  ;;  %v1053_v6 = vpop.f32.mrb[5].mxu0 }
 0x687   : > { %v819_v7 = vpop.f32.mrb[6].mxu0 }
 0x688   : > { %822 = vst [vmem:[%s338_s25] sm:$0x1] %v817_v5  ;;  %v1054_v8 = vpop.f32.mrb[7].mxu0 }
 0x689   : > { %1154 = shalt.err (!%p1151_p4)
}
 0x68a   : > { %s1155_s21 = scalar_lea.hbm %s1528_s24, 16  ;;  %s1159_s20 = scalar_lea.hbm %s1580_s8, 32 }
 0x68b   : > { %p1156_p5 = scmp.ne.s32.totalorder %s1528_s24, %s1155_s21  ;;  %p1160_p1 = scmp.lt.u32.totalorder %s1528_s24, %s1580_s8 }
 0x68c   : > { %p1161_p3 = scmp.lt.u32.totalorder %s1159_s20, %s1155_s21  ;;  %p1163_p11 = scmp.lt.u32.totalorder %s1155_s21, %s1528_s24 }
 0x68d   : > { %p1157_p7 = pnand %p1156_p5, %p1587_p12 }
 0x68e   : > { %p1162_p6 = por %p1161_p3, %p1160_p1 }
 0x68f   : > { %p1158_p9 = pneg %p1157_p7 }
 0x690   : > { %p1164_p13 = por %p1163_p11, %p1162_p6 }
 0x692   : > { %p1165_p8 = pnand %p1164_p13, %p1158_p9 }
 0x694   : > { %1168 = shalt.err (!%p1165_p8)
}
 0x695   : > { %1057 = dma.vmem_to_hbm [thread:$0]  (%p1587_p12), %s1530_s27, 16, %s1528_s24, %s824_s7  }
 0x696 PF: > { %s848_s28 = sand.u32 1, %s1195_s29   ;;  %p1588_p10 = scmp.ne.s32.totalorder %s1585_s19, 0 }
 0x697   : > { %p1589_p0 = scmp.ge.s32.totalorder %s1207_s10, 2  ;;  %s849_s11 = scalar_lea.sflag [#allocation6], %s848_s28 }
 0x699   : > { %p1064_p2 = pnand %p1589_p0, %p1588_p10 }
 0x69b   : > { %1190 = dma.done.wait (!%p1064_p2), %s849_s11, 16  }
 0x69c   : > { %1192 = vsyncadd (!%p1064_p2), %s849_s11, 4294967280  ;;  %p23_p4 = scmp.ge.s32.totalorder %s1292_s12, 4   ;;  %s1590_s29 = smov %s1199_s30 }
 0x69d   : > { %s1591_s30 = smov %s1203_s9  ;;  %s1592_s9 = smov %s1304_s15 }
 0x69e   : > { %s1593_s10 = smov %s1292_s12  ;;  %25 = sbr.rel (!%p23_p4) target bundleno = 8 (0x8), region = 103 }
 0x6a5   :  { %853 = vsyncpa [#allocation5], 1 }
 0x6a6   :  { %855 = vsyncpa [#allocation5 + $0x1], 1 }
 0x6a7   :  { %856 = vsyncpa [#allocation6], 1 }
 0x6a8   :  { %858 = vsyncpa [#allocation6 + $0x1], 1 }

</bundles_post_ra>
